<compile_context>
chip_gen: v7x
topology: tpu7x:2x2x1
jax: 0.10.0
libtpu: 0.0.40
codegen_flags: <defaults>
</compile_context>

<pallas_src>
import functools

import jax
import jax.numpy as jnp
from jax.experimental import pallas as pl
from jax.experimental.pallas import tpu as pltpu

KERNEL_SIZE = 7
PAD = 3          # padding for kernel_size=7
_LANE = 128
_SUBLANE = 8


def _round_up(v, m):
    return ((v + m - 1) // m) * m


def _choose_c_tile(C, HW, target_bytes=2 * 1024 * 1024):
    """Channel tile for the reduction: whole C if small, otherwise a
    multiple-of-8 divisor of C sized to ~target_bytes of f32 per input block
    (keeps double-buffered blocks well inside v5e/v7x scoped VMEM)."""
    target_elems = target_bytes // 4
    if C <= _SUBLANE or C * HW <= target_elems:
        return C
    ct = min(C, max(_SUBLANE, target_elems // max(HW, 1)))
    ct -= ct % _SUBLANE
    ct = max(ct, _SUBLANE)
    while ct > _SUBLANE and C % ct != 0:
        ct -= _SUBLANE
    return ct if C % ct == 0 else C


# ---------------------------------------------------------------------------
# Phase 1: channel max + mean over a lane-dense (Ct, H*W) slab.
# ---------------------------------------------------------------------------
def _pool_kernel(x_ref, max_ref, avg_ref, *, inv_c):
    # x_ref:   (1, Ct, HW) input block (lane-dense, last dim = H*W)
    # max_ref: (1, 1, HW)  running channel max (resident across the C axis)
    # avg_ref: (1, 1, HW)  running channel sum -> mean on the last C step
    cb = pl.program_id(1)

    x = x_ref[0].astype(jnp.float32)                 # (Ct, HW)
    blk_max = jnp.max(x, axis=0, keepdims=True)      # (1, HW)
    blk_sum = jnp.sum(x, axis=0, keepdims=True)      # (1, HW)

    @pl.when(cb == 0)
    def _init():
        max_ref[0] = blk_max
        avg_ref[0] = blk_sum

    @pl.when(cb > 0)
    def _accumulate():
        max_ref[0] = jnp.maximum(max_ref[0], blk_max)
        avg_ref[0] = avg_ref[0] + blk_sum

    @pl.when(cb == pl.num_programs(1) - 1)
    def _finalize():
        avg_ref[0] = avg_ref[0] * inv_c              # sum -> mean


# ---------------------------------------------------------------------------
# Phase 2: 7x7 conv (2 -> 1 channels) + sigmoid on the pooled maps.
# ---------------------------------------------------------------------------
def _conv_kernel(w_ref, max_ref, avg_ref, o_ref, pad_ref):
    # w_ref:   (98,) f32 in SMEM, flattened conv weight [in_ch, ky, kx]
    # max_ref: (1, H, W)  channel-max map for this batch element
    # avg_ref: (1, H, W)  channel-mean map
    # o_ref:   (1, H, W)  attention output
    # pad_ref: (2, Hp, Wc) f32 VMEM scratch, tile-aligned zero-padded maps
    _, H, W = o_ref.shape
    K = KERNEL_SIZE
    WL = _round_up(W, _LANE)          # lane-aligned accumulation width

    # Zero the whole scratch each step (border + lane slack stay zero; scratch
    # persists across grid steps so we cannot rely on prior contents), then
    # write the two pooled maps into the interior at offset (PAD, PAD).
    pad_ref[...] = jnp.zeros_like(pad_ref)
    pad_ref[0, PAD:PAD + H, PAD:PAD + W] = max_ref[0]
    pad_ref[1, PAD:PAD + H, PAD:PAD + W] = avg_ref[0]

    def conv_channel(ch):
        # Two independent partial accumulators break the 49-deep serial add
        # chain so the VLIW scheduler can fill VALU slots.
        acc_even = jnp.zeros((H, WL), jnp.float32)
        acc_odd = jnp.zeros((H, WL), jnp.float32)
        for dx in range(K):
            # One lane-shifted window per dx (in-bounds thanks to the +128
            # lane slack in Wc), reused across all 7 dy taps; the dy offsets
            # below are cheap sublane slices of this window.
            win = pad_ref[ch, :, dx:dx + WL]          # (Hp, WL)
            for dy in range(K):
                w_tap = w_ref[ch * K * K + dy * K + dx]
                tap = w_tap * win[dy:dy + H, :]
                if dy % 2 == 0:
                    acc_even = acc_even + tap
                else:
                    acc_odd = acc_odd + tap
        return acc_even + acc_odd

    conv = conv_channel(0) + conv_channel(1)          # (H, WL)
    o_ref[0] = jax.nn.sigmoid(conv[:, :W]).astype(o_ref.dtype)


# ---------------------------------------------------------------------------
# Wrapper
# ---------------------------------------------------------------------------
def spatial_attention(x, conv_weight):
    """x: (N, C, H, W); conv_weight: (1, 2, 7, 7) -> attention (N, 1, H, W)."""
    N, C, H, W = x.shape
    HW = H * W

    # Lane-dense layout for the memory-bound channel reduction.
    x_hw = x.reshape(N, C, HW)
    w_flat = conv_weight.reshape(-1).astype(jnp.float32)     # (98,)

    ct = _choose_c_tile(C, HW)
    assert C % ct == 0
    n_cb = C // ct

    max_out, avg_out = pl.pallas_call(
        functools.partial(_pool_kernel, inv_c=1.0 / C),
        out_shape=(
            jax.ShapeDtypeStruct((N, 1, HW), jnp.float32),
            jax.ShapeDtypeStruct((N, 1, HW), jnp.float32),
        ),
        grid_spec=pltpu.PrefetchScalarGridSpec(
            num_scalar_prefetch=0,
            grid=(N, n_cb),
            in_specs=[pl.BlockSpec((1, ct, HW), lambda n, cb: (n, cb, 0))],
            out_specs=(
                pl.BlockSpec((1, 1, HW), lambda n, cb: (n, 0, 0)),
                pl.BlockSpec((1, 1, HW), lambda n, cb: (n, 0, 0)),
            ),
        ),
        compiler_params=pltpu.CompilerParams(
            dimension_semantics=("parallel", "arbitrary"),
            vmem_limit_bytes=32 * 1024 * 1024,
        ),
    )(x_hw)

    # Pooled maps are tiny; reshaping them to 2-D in the wrapper is cheap and
    # avoids in-kernel relayout reshapes.
    max_map = max_out.reshape(N, H, W)
    avg_map = avg_out.reshape(N, H, W)

    # Tile-aligned padded scratch: rows rounded to 8 sublanes, lanes rounded to
    # 128 plus one extra lane-group of slack so every dx-shifted window load is
    # in bounds.
    hp = _round_up(H + 2 * PAD, _SUBLANE)
    wc = _round_up(W + 2 * PAD, _LANE) + _LANE

    att = pl.pallas_call(
        _conv_kernel,
        out_shape=jax.ShapeDtypeStruct((N, H, W), jnp.float32),
        grid_spec=pltpu.PrefetchScalarGridSpec(
            num_scalar_prefetch=0,
            grid=(N,),
            in_specs=[
                pl.BlockSpec(memory_space=pltpu.MemorySpace.SMEM),
                pl.BlockSpec((1, H, W), lambda n: (n, 0, 0)),
                pl.BlockSpec((1, H, W), lambda n: (n, 0, 0)),
            ],
            out_specs=pl.BlockSpec((1, H, W), lambda n: (n, 0, 0)),
            scratch_shapes=[pltpu.VMEM((2, hp, wc), jnp.float32)],
        ),
        compiler_params=pltpu.CompilerParams(
            dimension_semantics=("parallel",),
            vmem_limit_bytes=32 * 1024 * 1024,
        ),
    )(w_flat, max_map, avg_map)

    return att.reshape(N, 1, H, W)


def _reference(x, conv_weight):
    """Pure-JAX reference matching the PyTorch module."""
    max_pool = jnp.max(x, axis=1, keepdims=True)
    avg_pool = jnp.mean(x, axis=1, keepdims=True)
    pooled = jnp.concatenate([max_pool, avg_pool], axis=1)      # (N, 2, H, W)
    att = jax.lax.conv_general_dilated(
        pooled, conv_weight,
        window_strides=(1, 1), padding=((PAD, PAD), (PAD, PAD)),
        dimension_numbers=("NCHW", "OIHW", "NCHW"))
    return jax.nn.sigmoid(att)


if __name__ == "__main__":
    key = jax.random.PRNGKey(0)
    kx, kw = jax.random.split(key)

    # Small NCHW input consistent with the module.
    N, C, H, W = 2, 4, 16, 16
    x = jax.random.normal(kx, (N, C, H, W), dtype=jnp.float32)

    # Deterministic conv weight init (PyTorch conv default: U(-1/sqrt(fan_in), +)).
    fan_in = 2 * KERNEL_SIZE * KERNEL_SIZE
    bound = 1.0 / (fan_in ** 0.5)
    conv_weight = jax.random.uniform(
        kw, (1, 2, KERNEL_SIZE, KERNEL_SIZE),
        minval=-bound, maxval=bound, dtype=jnp.float32)

    out = jax.block_until_ready(spatial_attention(x, conv_weight))
    ref = jax.block_until_ready(_reference(x, conv_weight))

    assert out.shape == (N, 1, H, W)
    assert jnp.allclose(out, ref, atol=1e-5, rtol=1e-5), "mismatch vs reference"

    print("KERNEL_OK")
</pallas_src>

<mosaic_0001>
module attributes {stable_mosaic.version = 11 : i64} {
  func.func @_pool_kernel(%arg0: i32, %arg1: i32, %arg2: memref<1x4x256xf32, #tpu.memory_space<vmem>>, %arg3: memref<1x1x256xf32, #tpu.memory_space<vmem>>, %arg4: memref<1x1x256xf32, #tpu.memory_space<vmem>>) attributes {dimension_semantics = [#tpu.dimension_semantics<parallel>, #tpu.dimension_semantics<arbitrary>], iteration_bounds = array<i64: 2, 1>, scalar_prefetch = 0 : i64, scratch_operands = 0 : i64, tpu.core_type = #tpu.core_type<tc>, window_params = [{transform_indices = @transform_0, window_bounds = array<i64: 1, 4, 256>}, {transform_indices = @transform_1, window_bounds = array<i64: 1, 1, 256>}, {transform_indices = @transform_2, window_bounds = array<i64: 1, 1, 256>}]} {
    %c0 = arith.constant 0 : index
    %c0_0 = arith.constant 0 : index
    %c0_1 = arith.constant 0 : index
    %0 = vector.load %arg2[%c0, %c0_0, %c0_1] : memref<1x4x256xf32, #tpu.memory_space<vmem>>, vector<1x4x256xf32>
    %1 = vector.shape_cast %0 : vector<1x4x256xf32> to vector<4x256xf32>
    %cst = arith.constant dense<0xFF800000> : vector<256xf32>
    %2 = vector.multi_reduction <maximumf>, %1, %cst [0] : vector<4x256xf32> to vector<256xf32>
    %3 = vector.shape_cast %2 : vector<256xf32> to vector<1x256xf32>
    %cst_2 = arith.constant dense<0.000000e+00> : vector<256xf32>
    %4 = vector.multi_reduction <add>, %1, %cst_2 [0] : vector<4x256xf32> to vector<256xf32>
    %5 = vector.shape_cast %4 : vector<256xf32> to vector<1x256xf32>
    %c0_i32 = arith.constant 0 : i32
    %6 = arith.cmpi eq, %arg1, %c0_i32 : i32
    %7 = arith.extui %6 : i1 to i32
    %c0_i32_3 = arith.constant 0 : i32
    %8 = arith.cmpi ne, %7, %c0_i32_3 : i32
    scf.if %8 {
      %c0_8 = arith.constant 0 : index
      %c0_9 = arith.constant 0 : index
      %c0_10 = arith.constant 0 : index
      %15 = vector.load %arg3[%c0_8, %c0_9, %c0_10] : memref<1x1x256xf32, #tpu.memory_space<vmem>>, vector<1x1x256xf32>
      %16 = vector.shape_cast %15 : vector<1x1x256xf32> to vector<1x256xf32>
      %17 = vector.shape_cast %3 : vector<1x256xf32> to vector<1x1x256xf32>
      tpu.vector_store %arg3[%c0_8, %c0_9, %c0_10], %17 {strides = array<i32>} : memref<1x1x256xf32, #tpu.memory_space<vmem>>, vector<1x1x256xf32>,
      %c0_11 = arith.constant 0 : index
      %c0_12 = arith.constant 0 : index
      %c0_13 = arith.constant 0 : index
      %18 = vector.load %arg4[%c0_11, %c0_12, %c0_13] : memref<1x1x256xf32, #tpu.memory_space<vmem>>, vector<1x1x256xf32>
      %19 = vector.shape_cast %18 : vector<1x1x256xf32> to vector<1x256xf32>
      %20 = vector.shape_cast %5 : vector<1x256xf32> to vector<1x1x256xf32>
      tpu.vector_store %arg4[%c0_11, %c0_12, %c0_13], %20 {strides = array<i32>} : memref<1x1x256xf32, #tpu.memory_space<vmem>>, vector<1x1x256xf32>,
    } else {
    }
    %c0_i32_4 = arith.constant 0 : i32
    %9 = arith.cmpi sgt, %arg1, %c0_i32_4 : i32
    %10 = arith.extui %9 : i1 to i32
    %c0_i32_5 = arith.constant 0 : i32
    %11 = arith.cmpi ne, %10, %c0_i32_5 : i32
    scf.if %11 {
      %c0_8 = arith.constant 0 : index
      %c0_9 = arith.constant 0 : index
      %c0_10 = arith.constant 0 : index
      %15 = vector.load %arg3[%c0_8, %c0_9, %c0_10] : memref<1x1x256xf32, #tpu.memory_space<vmem>>, vector<1x1x256xf32>
      %16 = vector.shape_cast %15 : vector<1x1x256xf32> to vector<1x256xf32>
      %17 = arith.maximumf %16, %3 : vector<1x256xf32>
      %c0_11 = arith.constant 0 : index
      %c0_12 = arith.constant 0 : index
      %c0_13 = arith.constant 0 : index
      %18 = vector.load %arg3[%c0_11, %c0_12, %c0_13] : memref<1x1x256xf32, #tpu.memory_space<vmem>>, vector<1x1x256xf32>
      %19 = vector.shape_cast %18 : vector<1x1x256xf32> to vector<1x256xf32>
      %20 = vector.shape_cast %17 : vector<1x256xf32> to vector<1x1x256xf32>
      tpu.vector_store %arg3[%c0_11, %c0_12, %c0_13], %20 {strides = array<i32>} : memref<1x1x256xf32, #tpu.memory_space<vmem>>, vector<1x1x256xf32>,
      %c0_14 = arith.constant 0 : index
      %c0_15 = arith.constant 0 : index
      %c0_16 = arith.constant 0 : index
      %21 = vector.load %arg4[%c0_14, %c0_15, %c0_16] : memref<1x1x256xf32, #tpu.memory_space<vmem>>, vector<1x1x256xf32>
      %22 = vector.shape_cast %21 : vector<1x1x256xf32> to vector<1x256xf32>
      %23 = arith.addf %22, %5 : vector<1x256xf32>
      %c0_17 = arith.constant 0 : index
      %c0_18 = arith.constant 0 : index
      %c0_19 = arith.constant 0 : index
      %24 = vector.load %arg4[%c0_17, %c0_18, %c0_19] : memref<1x1x256xf32, #tpu.memory_space<vmem>>, vector<1x1x256xf32>
      %25 = vector.shape_cast %24 : vector<1x1x256xf32> to vector<1x256xf32>
      %26 = vector.shape_cast %23 : vector<1x256xf32> to vector<1x1x256xf32>
      tpu.vector_store %arg4[%c0_17, %c0_18, %c0_19], %26 {strides = array<i32>} : memref<1x1x256xf32, #tpu.memory_space<vmem>>, vector<1x1x256xf32>,
    } else {
    }
    %c0_i32_6 = arith.constant 0 : i32
    %12 = arith.cmpi eq, %arg1, %c0_i32_6 : i32
    %13 = arith.extui %12 : i1 to i32
    %c0_i32_7 = arith.constant 0 : i32
    %14 = arith.cmpi ne, %13, %c0_i32_7 : i32
    scf.if %14 {
      %c0_8 = arith.constant 0 : index
      %c0_9 = arith.constant 0 : index
      %c0_10 = arith.constant 0 : index
      %15 = vector.load %arg4[%c0_8, %c0_9, %c0_10] : memref<1x1x256xf32, #tpu.memory_space<vmem>>, vector<1x1x256xf32>
      %16 = vector.shape_cast %15 : vector<1x1x256xf32> to vector<1x256xf32>
      %cst_11 = arith.constant 2.500000e-01 : f32
      %17 = vector.broadcast %cst_11 : f32 to vector<1x256xf32>
      %18 = arith.mulf %16, %17 : vector<1x256xf32>
      %c0_12 = arith.constant 0 : index
      %c0_13 = arith.constant 0 : index
      %c0_14 = arith.constant 0 : index
      %19 = vector.load %arg4[%c0_12, %c0_13, %c0_14] : memref<1x1x256xf32, #tpu.memory_space<vmem>>, vector<1x1x256xf32>
      %20 = vector.shape_cast %19 : vector<1x1x256xf32> to vector<1x256xf32>
      %21 = vector.shape_cast %18 : vector<1x256xf32> to vector<1x1x256xf32>
      tpu.vector_store %arg4[%c0_12, %c0_13, %c0_14], %21 {strides = array<i32>} : memref<1x1x256xf32, #tpu.memory_space<vmem>>, vector<1x1x256xf32>,
    } else {
    }
    return
  }
  func.func @transform_0(%arg0: i32, %arg1: i32) -> (i32, i32, i32) {
    %c0_i32 = arith.constant 0 : i32
    %c0_i32_0 = arith.constant 0 : i32
    return %arg0, %arg1, %c0_i32 : i32, i32, i32
  }
  func.func @transform_1(%arg0: i32, %arg1: i32) -> (i32, i32, i32) {
    %c0_i32 = arith.constant 0 : i32
    %c0_i32_0 = arith.constant 0 : i32
    %c0_i32_1 = arith.constant 0 : i32
    return %arg0, %c0_i32, %c0_i32_0 : i32, i32, i32
  }
  func.func @transform_2(%arg0: i32, %arg1: i32) -> (i32, i32, i32) {
    %c0_i32 = arith.constant 0 : i32
    %c0_i32_0 = arith.constant 0 : i32
    %c0_i32_1 = arith.constant 0 : i32
    return %arg0, %c0_i32, %c0_i32_0 : i32, i32, i32
  }
}

</mosaic_0001>

<bundles_post_ra>
// kernel: tpu_custom_call.1
= control target key start
LH: loop header
LB: loop body
LE: loop exit
PB: predicated region body
PF: predicated region fallthrough
CT: control target
= control target key end

     0   :  { %8 = vsyncpa [#allocation3], 0  ;;  %s951_s0 = inlined_call_operand.hbm [shape: f32[2,4,256], index: 0, kind: input, shape index: {}]   ;;  %s952_s1 = inlined_call_operand.hbm [shape: f32[2,1,256], index: 1, kind: output, shape index: {0}]   ;;  %s953_s2 = inlined_call_operand.hbm [shape: f32[2,1,256], index: 2, kind: output, shape index: {1}]  }
   0x1   :  { %10 = vsyncpa [#allocation3 + $0x1], 0 }
   0x2   :  { %11 = vsyncpa [#allocation4], 0 }
   0x3   :  { %13 = vsyncpa [#allocation4 + $0x1], 0 }
   0x4   :  { %14 = vsyncpa [#allocation7], 0 }
   0x5   :  { %16 = vsyncpa [#allocation7 + $0x1], 0  ;;  %s729_s9 = smov 0   ;;  %s731_s10 = smov 0  }
   0x6   :  { %s733_s11 = smov 0   ;;  %s735_s12 = smov 0  }
   0x7   :  { %s737_s13 = smov 0   ;;  %s739_s14 = smov 0  }
   0x8 LB: > { %s473_s15 = sadd.s32 4294967295, %s708_s14   ;;  %s474_s16 = sadd.s32 4294967294, %s708_s14   ;;  %s708_s14 = sphi %s739_s14, %s22_s14   ;;  %s704_s13 = sphi %s737_s13, %s971_s13   ;;  %s700_s12 = sphi %s735_s12, %s970_s12   ;;  %s696_s11 = sphi %s733_s11, %s969_s11   ;;  %s692_s10 = sphi %s731_s10, %s968_s10   ;;  %s688_s9 = sphi %s729_s9, %s967_s9  }
   0x9   : > { %s34_s17 = sadd.s32 1, %s704_s13  ;;  %s43_s18 = sadd.s32 1, %s696_s11 }
   0xa   : > { %p36_p0 = scmp.ge.s32.totalorder %s34_s17, 2  ;;  %p50_p1 = scmp.ne.s32.totalorder %s696_s11, %s692_s10 }
   0xb   : > { %p51_p2 = scmp.eq.s32.totalorder %s708_s14, 0  ;;  %p56_p3 = scmp.ne.s32.totalorder %s692_s10, %s688_s9 }
   0xc   : > { %s973_s17 = smov (%p36_p0, %s34_s17), 0  ;;  %p57_p5 = scmp.eq.s32.totalorder %s473_s15, 0 }
   0xd   : > { %p770_p4 = por %p51_p2, %p50_p1  ;;  %s38_s20 = ssub.s32 %s704_s13, %s973_s17 }
   0xe   : > { %p80_p6 = scmp.eq.s32.totalorder %s473_s15, 1  ;;  %p41_p7 = scmp.eq.s32.totalorder %s38_s20, 0 }
   0xf   : > { %p776_p8 = por %p57_p5, %p56_p3  ;;  %p86_p10 = scmp.eq.s32.totalorder %s474_s16, 1 }
  0x10   : > { %p780_p9 = por %p80_p6, %p50_p1  ;;  %p512_p13 = scmp.lt.s32.totalorder %s708_s14, 2 }
  0x11   : > { %s785_s23 = scalar_select %p41_p7, %s696_s11, %s43_s18  }
  0x12   : > { %s957_s22 = scalar_select %p780_p9, 1, 0 }
  0x13   : > { %p787_p11 = por %p86_p10, %p56_p3  ;;  %s132_s25 = sand.u32 1, %s696_s11  }
  0x14   : > { %s477_s26 = sshll.u32 %s132_s25, 3  ;;  %s492_s27 = sshll.u32 %s704_s13, 7 }
  0x15   : > { %s958_s24 = scalar_select %p787_p11, 1, 0 }
  0x16   : > { %s798_s30 = scalar_lea.hbm %s951_s0, %s492_s27  ;;  %s136_s3 = scalar_lea.vmem [#allocation2], %s477_s26 }
  0x17   : > { %s146_s4 = sshll.u32 %s136_s3, 4  ;;  %p804_p0 = pnand %p512_p13, %p770_p4  ;;  %s800_s4 = int_to_ptr.vmem [resolvable:$true] %s146_s4 }
  0x18   : > { %s133_s6 = scalar_lea.sflag [#allocation3], %s132_s25  ;;  %s564_s7 = scalar_lea.hbm %s798_s30, 128 }
  0x19   : > { %p565_p3 = scmp.ne.s32.totalorder %s798_s30, %s564_s7  ;;  %p566_p5 = pneg %p804_p0 }
  0x1a   : > { %s569_s16 = scalar_lea.hbm %s951_s0, 256  ;;  %p570_p4 = scmp.lt.u32.totalorder %s798_s30, %s951_s0 }
  0x1b   : > { %p567_p6 = pnand %p566_p5, %p565_p3  ;;  %p571_p10 = scmp.lt.u32.totalorder %s569_s16, %s564_s7 }
  0x1c   : > { %p573_p12 = scmp.lt.u32.totalorder %s564_s7, %s798_s30 }
  0x1d   : > { %p568_p7 = pneg %p567_p6  ;;  %p572_p13 = por %p571_p10, %p570_p4 }
  0x1f   : > { %p574_p1 = por %p573_p12, %p572_p13 }
  0x21   : > { %p575_p2 = pnand %p574_p1, %p568_p7 }
  0x23   : > { %578 = shalt.err (!%p575_p2)
}
  0x24   : > { %s579_s20 = scalar_lea.vmem %s800_s4, 128  ;;  %s710_s25 = smov [#allocation2]  }
  0x25   : > { %p580_p3 = scmp.ne.s32.totalorder %s800_s4, %s579_s20  ;;  %s584_s26 = sshll.u32 %s710_s25, 4  ;;  %s585_s26 = int_to_ptr.vmem [resolvable:$false] %s584_s26 }
  0x26   : > { %s586_s27 = scalar_lea.vmem %s585_s26, 256  ;;  %p587_p9 = scmp.lt.s32.totalorder %s800_s4, %s585_s26 }
  0x27   : > { %p582_p6 = pnand %p580_p3, %p566_p5  ;;  %p588_p4 = scmp.lt.s32.totalorder %s586_s27, %s579_s20 }
  0x29   : > { %p583_p11 = pneg %p582_p6  ;;  %p589_p10 = por %p588_p4, %p587_p9 }
  0x2b   : > { %p590_p12 = pnand %p589_p10, %p583_p11 }
  0x2d   : > { %593 = shalt.err (!%p590_p12)
}
  0x2e   : > { %504 = dma.hbm_to_vmem [thread:$0]  (!%p804_p0), %s798_s30, 128, %s800_s4, %s133_s6  }
  0x2f   : > { %p960_p1 = scmp.lt.s32.totalorder %s708_s14, 3  ;;  %p961_p2 = scmp.ge.s32.totalorder %s708_s14, 1 }
  0x31   : > { %p152_p5 = pnand %p961_p2, %p960_p1 }
  0x32   : > { %s840_s28 = sand.u32 (!%p152_p5), 1, %s692_s10  }
  0x33   : > { %155 = sbr.rel (%p152_p5) target bundleno = 119 (0x77), region = 24  ;;  %s481_s29 = sshll.u32 (!%p152_p5), %s840_s28, 3 }
  0x34   : > { %s158_s3 = scalar_lea.sflag (!%p152_p5), [#allocation3], %s840_s28  ;;  %s161_s7 = scalar_lea.vmem (!%p152_p5), [#allocation2], %s481_s29 }
  0x3a   : > { %675 = dma.done.wait (%p776_p8), %s158_s3, 128  }
  0x3b   : > { %677 = vsyncadd (%p776_p8), %s158_s3, 4294967168  ;;  %vm191_vm0 = vcmask 1043456   ;;  %v187_v0 = vld [vmem:[%s161_s7] sm:$0xff]  ;;  %v711_v12 = vmov 1966171168   ;;  %v230_v14 = vlaneseq  ;;  %s482_s21 = sshll.u32 %s840_s28, 1 }
  0x3c   : > { %v189_v1 = vcombine.high %v187_v0, %v187_v0  ;;  %v206_v2 = vsel %vm191_vm0, %v187_v0, 0.0  ;;  %v192_v3 = vsel %vm191_vm0, %v187_v0, -inf  ;;  %v228_v13 = vunpack.c.l.s4 %v711_v12  ;;  %s179_s30 = scalar_lea.vmem [#allocation5], %s482_s21  ;;  %s493_s5 = sshll.u32 %s700_s12, 5 }
  0x3d   : > { %v207_v4 = vrot.slane %v206_v2, 4  ;;  %v193_v5 = vrot.slane %v192_v3, 4  ;;  %v231_v24 = vshrl.u32 %v230_v14, 7  ;;  %s346_s4 = sshll.u32 %s179_s30, 4  ;;  %vm850_vm1 = vcmp.lt.s32.totalorder %v230_v14, 256  ;;  %s861_s15 = scalar_lea.hbm %s952_s1, %s493_s5  ;;  %s854_s4 = int_to_ptr.vmem [resolvable:$true] %s346_s4 }
  0x3e   : > { %v213_v6 = vsel %vm191_vm0, %v189_v1, 0.0  ;;  %v199_v7 = vsel %vm191_vm0, %v189_v1, -inf  ;;  %v229_v23 = vunpack.c.0.s8 %v228_v13  ;;  %s863_s16 = scalar_lea.vmem [#allocation6], %s482_s21  ;;  %s327_s18 = scalar_lea.sflag [#allocation4], %s840_s28 }
  0x3f   : > { %v208_v8 = vadd.f32 %v207_v4, %v206_v2  ;;  %v214_v9 = vrot.slane %v213_v6, 4  ;;  %v194_v10 = vmax.f32 %v192_v3, %v193_v5  ;;  %v200_v11 = vrot.slane %v199_v7, 4  ;;  %s594_s19 = scalar_lea.vmem %s854_s4, 32  ;;  %p964_p9 = scmp.ne.s32.totalorder %s957_s22, 0 }
  0x40   : > { %v232_v34 = vsub.s32 %v229_v23, %v231_v24  ;;  %p595_p8 = scmp.ne.s32.totalorder %s854_s4, %s594_s19  ;;  %s712_s20 = smov [#allocation5]  }
  0x41   : > { %v209_v15 = vrot.slane %v208_v8, 2  ;;  %v215_v16 = vadd.f32 %v214_v9, %v213_v6  ;;  %v195_v17 = vrot.slane %v194_v10, 2  ;;  %v201_v18 = vmax.f32 %v199_v7, %v200_v11  ;;  %s598_s25 = sshll.u32 %s712_s20, 4  ;;  %s599_s25 = int_to_ptr.vmem [resolvable:$false] %s598_s25 }
  0x42   : > { %p596_p11 = pnand %p595_p8, %p964_p9  ;;  %s600_s26 = scalar_lea.vmem %s599_s25, 64 }
  0x43   : > { %v210_v19 = vadd.f32 %v209_v15, %v208_v8  ;;  %v216_v20 = vrot.slane %v215_v16, 2  ;;  %v196_v21 = vmax.f32 %v194_v10, %v195_v17  ;;  %v202_v22 = vrot.slane %v201_v18, 2  ;;  %p601_p7 = scmp.lt.s32.totalorder %s854_s4, %s599_s25  ;;  %p602_p13 = scmp.lt.s32.totalorder %s600_s26, %s594_s19 }
  0x44   : > { %p597_p0 = pneg %p596_p11 }
  0x45   : > { %v211_v25 = vrot.slane %v210_v19, 1  ;;  %v217_v26 = vadd.f32 %v216_v20, %v215_v16  ;;  %v197_v27 = vrot.slane %v196_v21, 1  ;;  %v203_v28 = vmax.f32 %v201_v18, %v202_v22  ;;  %p603_p3 = por %p602_p13, %p601_p7 }
  0x47   : > { %v212_v29 = vadd.f32 %v211_v25, %v210_v19  ;;  %v218_v30 = vrot.slane %v217_v26, 1  ;;  %v198_v31 = vmax.f32 %v196_v21, %v197_v27  ;;  %v204_v32 = vrot.slane %v203_v28, 1  ;;  %p604_p6 = pnand %p603_p3, %p597_p0 }
  0x49   : > { %v219_v33 = vadd.f32 %v218_v30, %v217_v26  ;;  %v205_v35 = vmax.f32 %v203_v28, %v204_v32 }
  0x4b   : > { %v249_v36 = vcombine.low %v212_v29, %v219_v33  ;;  %v226_v37 = vcombine.low %v198_v31, %v205_v35 }
  0x4d   : > { %v256_v38 = vrot.slane %v249_v36, %v232_v34  ;;  %v233_v39 = vrot.slane %v226_v37, %v232_v34 }
  0x4f   : > { %v263_v41 = vrot.slane %v256_v38, %v232_v34  ;;  %v240_v42 = vrot.slane %v233_v39, %v232_v34 }
  0x51   : > { %265 = vst.msk [vmem:[%s863_s16] sm:$0x3] %vm850_vm1, %v263_v41  ;;  %246 = vst.msk [vmem:[%s179_s30] sm:$0x3] %vm850_vm1, %v240_v42 }
  0x52   : > { %607 = shalt.err (!%p604_p6)
}
  0x53   : > { %s608_s27 = scalar_lea.hbm %s861_s15, 32  ;;  %s612_s7 = scalar_lea.hbm %s952_s1, 64 }
  0x54   : > { %p609_p4 = scmp.ne.s32.totalorder %s861_s15, %s608_s27  ;;  %p613_p1 = scmp.lt.u32.totalorder %s861_s15, %s952_s1 }
  0x55   : > { %p614_p2 = scmp.lt.u32.totalorder %s612_s7, %s608_s27  ;;  %p616_p8 = scmp.lt.u32.totalorder %s608_s27, %s861_s15 }
  0x56   : > { %p610_p10 = pnand %p609_p4, %p964_p9 }
  0x57   : > { %p615_p5 = por %p614_p2, %p613_p1 }
  0x58   : > { %p611_p12 = pneg %p610_p10 }
  0x59   : > { %p617_p11 = por %p616_p8, %p615_p5 }
  0x5b   : > { %p618_p0 = pnand %p617_p11, %p611_p12 }
  0x5d   : > { %621 = shalt.err (!%p618_p0)
}
  0x5e   : > { %497 = dma.vmem_to_hbm [thread:$0]  (%p964_p9), %s854_s4, 32, %s861_s15, %s327_s18   ;;  %v319_v43 = vld [vmem:[%s863_s16] sm:$0x3] }
  0x5f   : > { %s360_s6 = sshll.u32 %s863_s16, 4  ;;  %v320_v44 = vmul.f32 0.25, %v319_v43  ;;  %s899_s20 = scalar_lea.hbm %s953_s2, %s493_s5  ;;  %s901_s6 = int_to_ptr.vmem [resolvable:$true] %s360_s6 }
  0x60   : > { %s332_s25 = scalar_lea.sflag [#allocation7], %s840_s28  ;;  %s622_s26 = scalar_lea.vmem %s901_s6, 32 }
  0x61   : > { %325 = vst.msk [vmem:[%s863_s16] sm:$0x3] %vm850_vm1, %v320_v44  ;;  %p623_p7 = scmp.ne.s32.totalorder %s901_s6, %s622_s26  ;;  %s713_s12 = smov [#allocation6]  }
  0x62   : > { %s626_s4 = sshll.u32 %s713_s12, 4  ;;  %s627_s4 = int_to_ptr.vmem [resolvable:$false] %s626_s4 }
  0x63   : > { %p624_p13 = pnand %p623_p7, %p964_p9  ;;  %s628_s15 = scalar_lea.vmem %s627_s4, 64 }
  0x64   : > { %p629_p6 = scmp.lt.s32.totalorder %s901_s6, %s627_s4  ;;  %p630_p4 = scmp.lt.s32.totalorder %s628_s15, %s622_s26 }
  0x65   : > { %p625_p3 = pneg %p624_p13 }
  0x66   : > { %p631_p10 = por %p630_p4, %p629_p6 }
  0x68   : > { %p632_p12 = pnand %p631_p10, %p625_p3 }
  0x6a   : > { %635 = shalt.err (!%p632_p12)
}
  0x6b   : > { %s636_s28 = scalar_lea.hbm %s899_s20, 32  ;;  %s640_s18 = scalar_lea.hbm %s953_s2, 64 }
  0x6c   : > { %p637_p1 = scmp.ne.s32.totalorder %s899_s20, %s636_s28  ;;  %p641_p8 = scmp.lt.u32.totalorder %s899_s20, %s953_s2 }
  0x6d   : > { %p642_p11 = scmp.lt.u32.totalorder %s640_s18, %s636_s28  ;;  %p644_p7 = scmp.lt.u32.totalorder %s636_s28, %s899_s20 }
  0x6e   : > { %p638_p2 = pnand %p637_p1, %p964_p9 }
  0x6f   : > { %p643_p0 = por %p642_p11, %p641_p8 }
  0x70   : > { %p639_p5 = pneg %p638_p2 }
  0x71   : > { %p645_p13 = por %p644_p7, %p643_p0 }
  0x73   : > { %p646_p3 = pnand %p645_p13, %p639_p5 }
  0x75   : > { %649 = shalt.err (!%p646_p3)
}
  0x76   : > { %498 = dma.vmem_to_hbm [thread:$0]  (%p964_p9), %s901_s6, 32, %s899_s20, %s332_s25  }
  0x77 PF: > { %s372_s3 = sand.u32 1, %s688_s9   ;;  %p965_p6 = scmp.ne.s32.totalorder %s958_s24, 0 }
  0x78   : > { %p966_p4 = scmp.ge.s32.totalorder %s708_s14, 2  ;;  %s373_s7 = scalar_lea.sflag [#allocation4], %s372_s3 }
  0x7a   : > { %p506_p10 = pnand %p966_p4, %p965_p6 }
  0x7c   : > { %679 = dma.done.wait (!%p506_p10), %s373_s7, 32  }
  0x7d   : > { %681 = vsyncadd (!%p506_p10), %s373_s7, 4294967264  ;;  %s382_s21 = scalar_lea.sflag [#allocation7], %s372_s3 }
  0x7e   : > { %683 = dma.done.wait (!%p506_p10), %s382_s21, 32  }
  0x7f   : > { %685 = vsyncadd (!%p506_p10), %s382_s21, 4294967264  ;;  %s22_s14 = sadd.s32 1, %s708_s14   ;;  %s967_s9 = smov %s692_s10 }
  0x80   : > { %p19_p12 = scmp.ge.s32.totalorder %s22_s14, 4   ;;  %s968_s10 = smov %s696_s11 }
  0x81   : > { %s969_s11 = smov %s785_s23  ;;  %s970_s12 = smov %s704_s13 }
  0x82   : > { %s971_s13 = smov %s973_s17  ;;  %21 = sbr.rel (!%p19_p12) target bundleno = 8 (0x8), region = 98 }
  0x89   :  { %387 = vsyncpa [#allocation3], 1 }
  0x8a   :  { %389 = vsyncpa [#allocation3 + $0x1], 1 }
  0x8b   :  { %390 = vsyncpa [#allocation4], 1 }
  0x8c   :  { %392 = vsyncpa [#allocation4 + $0x1], 1 }
  0x8d   :  { %393 = vsyncpa [#allocation7], 1 }
  0x8e   :  { %395 = vsyncpa [#allocation7 + $0x1], 1 }

</bundles_post_ra>
